<compile_context>
chip_gen: v7x
topology: tpu7x:2x2x1
jax: 0.10.0
libtpu: 0.0.40
codegen_flags: <defaults>
</compile_context>

<pallas_src>
import math

import jax
import jax.numpy as jnp
from jax.experimental import pallas as pl
from jax.experimental.pallas import tpu as pltpu

LN_EPS = 1e-5  # torch.nn.LayerNorm default


def _vmem_config():
    """Returns (tile_budget_bytes, vmem_limit_bytes) per TensorCore."""
    vmem_total = 128 * 1024 * 1024
    try:
        vmem_total = int(pltpu.get_tpu_info().vmem_capacity_bytes)
    except Exception:
        pass
    if vmem_total <= 64 * 1024 * 1024:
        # v7x: 64 MiB per TensorCore -> budget ~24 MiB for streamed tiles.
        return 24 * 1024 * 1024, 48 * 1024 * 1024
    # v5e / v6e: 128 MiB physical per core (default scoped is only 16/32 MiB,
    # so the limit must be raised explicitly).
    return 48 * 1024 * 1024, 96 * 1024 * 1024


def _largest_divisor_leq(n, cap):
    cap = max(1, min(n, cap))
    for d in range(cap, 0, -1):
        if n % d == 0:
            return d
    return 1


def face_classifier_swin_head(features, gamma, beta, w, b, *,
                              block_b=None, block_sp=None,
                              tile_budget_bytes=None, vmem_limit_bytes=None):
    """features: (B, S, Hf, Wf, C) bf16 backbone output (NHWC per frame).
       gamma/beta: (C,) f32 LayerNorm params.
       w: (num_classes, C) f32 torch-style Linear weight;  b: (num_classes,) f32.
       returns logits (B, num_classes) f32."""
    B, S, Hf, Wf, C = features.shape
    SP = S * Hf * Wf                        # fused spatial+temporal reduction axis
    NC = w.shape[0]
    NCP = max(128, ((NC + 127) // 128) * 128)   # lane-dense classifier width

    feats = features.reshape(B, SP, C)      # contiguous merge, no copy
    itemsize = feats.dtype.itemsize

    auto_budget, auto_limit = _vmem_config()
    if tile_budget_bytes is None:
        tile_budget_bytes = auto_budget
    if vmem_limit_bytes is None:
        vmem_limit_bytes = auto_limit

    # One streamed feature block costs ~4x its bf16 bytes in VMEM
    # (double-buffered bf16 DMA block + transient f32 copy for the VPU sum).
    target_block_bytes = max(64 * 1024, tile_budget_bytes // 4)

    # ---- batch tile: divides B (no wrapper-side pad); <= B//2 when B >= 2 so
    # both v7x TensorCores get at least one batch block each.
    if block_b is None:
        cap = max(1, B // 2) if B >= 2 else 1
        cap = min(cap, max(1, target_block_bytes // (8 * C * itemsize)))
        block_b = _largest_divisor_leq(B, cap)
    TB = int(block_b)
    nb = B // TB

    # ---- SP tile: multiple of 8 (or the full extent); ragged tail is masked
    # in-kernel so no HBM->HBM pad copy of the feature tensor is ever made.
    if block_sp is None:
        spt_cap = max(8, target_block_bytes // (TB * C * itemsize))
        block_sp = SP if spt_cap >= SP else max(8, (spt_cap // 8) * 8)
    SPT = int(min(block_sp, SP))
    if SPT != SP:
        SPT = max(8, (SPT // 8) * 8)
    nk = pl.cdiv(SP, SPT)
    ragged = (SP % SPT) != 0
    inv_sp = 1.0 / float(SP)

    # ---- parameters (fp32), classifier lane-padded to NCP.
    gamma2 = gamma.reshape(1, C).astype(jnp.float32)
    beta2 = beta.reshape(1, C).astype(jnp.float32)
    w_t = jnp.zeros((C, NCP), jnp.float32).at[:, :NC].set(
        jnp.asarray(w, jnp.float32).T)
    bias2 = jnp.zeros((1, NCP), jnp.float32).at[:, :NC].set(
        jnp.asarray(b, jnp.float32).reshape(1, NC))

    def _head_kernel(feat_ref, gamma_ref, beta_ref, w_ref, b_ref, out_ref, acc_ref):
        """feat_ref : (TB, SPT, C)  bf16   streamed feature tile
           gamma_ref: (1, C)   f32   LayerNorm weight
           beta_ref : (1, C)   f32   LayerNorm bias
           w_ref    : (C, NCP) f32   classifier weight (transposed, lane-padded)
           b_ref    : (1, NCP) f32   classifier bias (lane-padded)
           out_ref  : (1, TB, NCP) f32  logits block
           acc_ref  : (TB, C)  f32   running sums over S*Hf*Wf."""
        ki = pl.program_id(1)

        @pl.when(ki == 0)
        def _init():
            acc_ref[...] = jnp.zeros_like(acc_ref)

        chunk = feat_ref[...].astype(jnp.float32)            # (TB, SPT, C)
        if ragged:
            # Last SP tile may read past SP: zero the invalid rows (select, so
            # garbage NaNs cannot propagate).  inv_sp stays 1/real_SP.
            valid = SP - ki * SPT
            row_ok = jax.lax.broadcasted_iota(jnp.int32, (SPT, C), 0) < valid
            chunk = jnp.where(row_ok[None, :, :], chunk, 0.0)
        acc_ref[...] += jnp.sum(chunk, axis=1)               # (TB, C) partial sums

        @pl.when(ki == pl.num_programs(1) - 1)
        def _finalize():
            agg = acc_ref[...] * inv_sp                      # mean over S*Hf*Wf
            # nn.Dropout(p=0.5) -> identity at inference time.
            mu = jnp.mean(agg, axis=-1, keepdims=True)
            xc = agg - mu
            var = jnp.mean(xc * xc, axis=-1, keepdims=True)
            x = xc * jax.lax.rsqrt(var + LN_EPS)
            x = x * gamma_ref[...] + beta_ref[...]           # (TB, C)
            # fp32 Linear (autocast-disabled region in the original module).
            logits = jnp.dot(x, w_ref[...], preferred_element_type=jnp.float32)
            out_ref[0] = logits + b_ref[...]                 # (TB, NCP)

    cost = pl.CostEstimate(
        flops=2 * B * SP * C + 8 * B * C + 2 * B * C * NCP,
        transcendentals=B,
        bytes_accessed=B * SP * C * itemsize
        + (2 * C + C * NCP + NCP) * 4 + B * NCP * 4,
    )

    out = pl.pallas_call(
        _head_kernel,
        out_shape=jax.ShapeDtypeStruct((nb, TB, NCP), jnp.float32),
        grid=(nb, nk),
        in_specs=[
            pl.BlockSpec((TB, SPT, C), lambda bi, ki: (bi, ki, 0)),
            pl.BlockSpec((1, C), lambda bi, ki: (0, 0)),
            pl.BlockSpec((1, C), lambda bi, ki: (0, 0)),
            pl.BlockSpec((C, NCP), lambda bi, ki: (0, 0)),
            pl.BlockSpec((1, NCP), lambda bi, ki: (0, 0)),
        ],
        out_specs=pl.BlockSpec((1, TB, NCP), lambda bi, ki: (bi, 0, 0)),
        scratch_shapes=[pltpu.VMEM((TB, C), jnp.float32)],
        compiler_params=pltpu.CompilerParams(
            dimension_semantics=("parallel", "arbitrary"),
            vmem_limit_bytes=int(vmem_limit_bytes)),
        cost_estimate=cost,
    )(feats, gamma2, beta2, w_t, bias2)

    return out.reshape(B, NCP)[:, :NC]


def _reference(features, gamma, beta, w, b):
    """Plain-JAX reference of the same head (fp32)."""
    f = features.astype(jnp.float32)
    agg = f.mean(axis=(2, 3)).mean(axis=1)                       # (B, C)
    mu = agg.mean(-1, keepdims=True)
    var = ((agg - mu) ** 2).mean(-1, keepdims=True)
    x = (agg - mu) * jax.lax.rsqrt(var + LN_EPS) * gamma + beta
    return x @ w.astype(jnp.float32).T + b


if __name__ == "__main__":
    # Small shapes consistent with the module: final Swin stage features are
    # (B*S, Hf, Wf, num_features); here B=2, S=2, Hf=Wf=8, num_features=256.
    B, S, Hf, Wf, C = 2, 2, 8, 8, 256
    NUM_CLASSES = 2

    key = jax.random.PRNGKey(0)
    k_feat, k_w, k_b = jax.random.split(key, 3)

    # Synthetic backbone output (half precision, mimicking the fp16 autocast
    # region; bf16 is the TPU-native low-precision dtype).
    features = jax.random.normal(
        k_feat, (B, S, Hf, Wf, C), dtype=jnp.float32).astype(jnp.bfloat16)

    # Deterministic parameter init (shapes from __init__):
    #   nn.LayerNorm(num_features): weight=ones, bias=zeros
    #   nn.Linear(num_features, num_classes): uniform(-1/sqrt(C), 1/sqrt(C))
    gamma = jnp.ones((C,), jnp.float32)
    beta = jnp.zeros((C,), jnp.float32)
    bound = 1.0 / math.sqrt(C)
    w = jax.random.uniform(k_w, (NUM_CLASSES, C), jnp.float32, -bound, bound)
    b = jax.random.uniform(k_b, (NUM_CLASSES,), jnp.float32, -bound, bound)

    logits = face_classifier_swin_head(features, gamma, beta, w, b)
    jax.block_until_ready(logits)

    ref = _reference(features, gamma, beta, w, b)
    assert logits.shape == (B, NUM_CLASSES)
    assert jnp.allclose(logits, ref, atol=1e-2, rtol=1e-2), (logits, ref)

    print("KERNEL_OK")
</pallas_src>

<mosaic_0001>
module attributes {stable_mosaic.version = 11 : i64} {
  func.func @_head_kernel(%arg0: i32, %arg1: i32, %arg2: memref<1x128x256xbf16, #tpu.memory_space<vmem>>, %arg3: memref<1x256xf32, #tpu.memory_space<vmem>>, %arg4: memref<1x256xf32, #tpu.memory_space<vmem>>, %arg5: memref<256x128xf32, #tpu.memory_space<vmem>>, %arg6: memref<1x128xf32, #tpu.memory_space<vmem>>, %arg7: memref<1x1x128xf32, #tpu.memory_space<vmem>>, %arg8: memref<1x256xf32, #tpu.memory_space<vmem>>) attributes {dimension_semantics = [#tpu.dimension_semantics<parallel>, #tpu.dimension_semantics<arbitrary>], iteration_bounds = array<i64: 2, 1>, scalar_prefetch = 0 : i64, scratch_operands = 1 : i64, tpu.core_type = #tpu.core_type<tc>, window_params = [{transform_indices = @transform_0, window_bounds = array<i64: 1, 128, 256>}, {pipeline_mode = #tpu.pipeline_mode<synchronous>, transform_indices = @transform_1, window_bounds = array<i64: 1, 256>}, {pipeline_mode = #tpu.pipeline_mode<synchronous>, transform_indices = @transform_2, window_bounds = array<i64: 1, 256>}, {pipeline_mode = #tpu.pipeline_mode<synchronous>, transform_indices = @transform_3, window_bounds = array<i64: 256, 128>}, {pipeline_mode = #tpu.pipeline_mode<synchronous>, transform_indices = @transform_4, window_bounds = array<i64: 1, 128>}, {transform_indices = @transform_5, window_bounds = array<i64: 1, 1, 128>}]} {
    %c0_i32 = arith.constant 0 : i32
    %0 = arith.cmpi eq, %arg1, %c0_i32 : i32
    %1 = arith.extui %0 : i1 to i32
    %c0_i32_0 = arith.constant 0 : i32
    %2 = arith.cmpi ne, %1, %c0_i32_0 : i32
    scf.if %2 {
      %cst_9 = arith.constant 0.000000e+00 : f32
      %12 = vector.broadcast %cst_9 : f32 to vector<1x256xf32>
      %c0_10 = arith.constant 0 : index
      %c0_11 = arith.constant 0 : index
      %13 = vector.load %arg8[%c0_10, %c0_11] : memref<1x256xf32, #tpu.memory_space<vmem>>, vector<1x256xf32>
      tpu.vector_store %arg8[%c0_10, %c0_11], %12 {strides = array<i32>} : memref<1x256xf32, #tpu.memory_space<vmem>>, vector<1x256xf32>,
    } else {
    }
    %c0 = arith.constant 0 : index
    %c0_1 = arith.constant 0 : index
    %c0_2 = arith.constant 0 : index
    %3 = vector.load %arg2[%c0, %c0_1, %c0_2] : memref<1x128x256xbf16, #tpu.memory_space<vmem>>, vector<1x128x256xbf16>
    %4 = arith.extf %3 : vector<1x128x256xbf16> to vector<1x128x256xf32>
    %c0_3 = arith.constant 0 : index
    %c0_4 = arith.constant 0 : index
    %5 = vector.load %arg8[%c0_3, %c0_4] : memref<1x256xf32, #tpu.memory_space<vmem>>, vector<1x256xf32>
    %cst = arith.constant dense<0.000000e+00> : vector<1x256xf32>
    %6 = vector.multi_reduction <add>, %4, %cst [1] : vector<1x128x256xf32> to vector<1x256xf32>
    %7 = arith.addf %5, %6 : vector<1x256xf32>
    %c0_5 = arith.constant 0 : index
    %c0_6 = arith.constant 0 : index
    %8 = vector.load %arg8[%c0_5, %c0_6] : memref<1x256xf32, #tpu.memory_space<vmem>>, vector<1x256xf32>
    tpu.vector_store %arg8[%c0_5, %c0_6], %7 {strides = array<i32>} : memref<1x256xf32, #tpu.memory_space<vmem>>, vector<1x256xf32>,
    %c0_i32_7 = arith.constant 0 : i32
    %9 = arith.cmpi eq, %arg1, %c0_i32_7 : i32
    %10 = arith.extui %9 : i1 to i32
    %c0_i32_8 = arith.constant 0 : i32
    %11 = arith.cmpi ne, %10, %c0_i32_8 : i32
    scf.if %11 {
      %c0_9 = arith.constant 0 : index
      %c0_10 = arith.constant 0 : index
      %12 = vector.load %arg8[%c0_9, %c0_10] : memref<1x256xf32, #tpu.memory_space<vmem>>, vector<1x256xf32>
      %cst_11 = arith.constant 7.812500e-03 : f32
      %13 = vector.broadcast %cst_11 : f32 to vector<1x256xf32>
      %14 = arith.mulf %12, %13 : vector<1x256xf32>
      %cst_12 = arith.constant dense<0.000000e+00> : vector<1xf32>
      %15 = vector.multi_reduction <add>, %14, %cst_12 [1] : vector<1x256xf32> to vector<1xf32>
      %16 = vector.shape_cast %15 : vector<1xf32> to vector<1x1xf32>
      %cst_13 = arith.constant 2.560000e+02 : f32
      %17 = vector.broadcast %cst_13 : f32 to vector<1x1xf32>
      %18 = arith.divf %16, %17 : vector<1x1xf32>
      %19 = vector.broadcast %18 : vector<1x1xf32> to vector<1x256xf32>
      %20 = arith.subf %14, %19 : vector<1x256xf32>
      %21 = arith.mulf %20, %20 : vector<1x256xf32>
      %cst_14 = arith.constant dense<0.000000e+00> : vector<1xf32>
      %22 = vector.multi_reduction <add>, %21, %cst_14 [1] : vector<1x256xf32> to vector<1xf32>
      %23 = vector.shape_cast %22 : vector<1xf32> to vector<1x1xf32>
      %cst_15 = arith.constant 2.560000e+02 : f32
      %24 = vector.broadcast %cst_15 : f32 to vector<1x1xf32>
      %25 = arith.divf %23, %24 : vector<1x1xf32>
      %cst_16 = arith.constant 9.99999974E-6 : f32
      %26 = vector.broadcast %cst_16 : f32 to vector<1x1xf32>
      %27 = arith.addf %25, %26 : vector<1x1xf32>
      %28 = math.rsqrt %27 : vector<1x1xf32>
      %29 = vector.broadcast %28 : vector<1x1xf32> to vector<1x256xf32>
      %30 = arith.mulf %20, %29 : vector<1x256xf32>
      %c0_17 = arith.constant 0 : index
      %c0_18 = arith.constant 0 : index
      %31 = vector.load %arg3[%c0_17, %c0_18] : memref<1x256xf32, #tpu.memory_space<vmem>>, vector<1x256xf32>
      %32 = arith.mulf %30, %31 : vector<1x256xf32>
      %c0_19 = arith.constant 0 : index
      %c0_20 = arith.constant 0 : index
      %33 = vector.load %arg4[%c0_19, %c0_20] : memref<1x256xf32, #tpu.memory_space<vmem>>, vector<1x256xf32>
      %34 = arith.addf %32, %33 : vector<1x256xf32>
      %c0_21 = arith.constant 0 : index
      %c0_22 = arith.constant 0 : index
      %35 = vector.load %arg5[%c0_21, %c0_22] : memref<256x128xf32, #tpu.memory_space<vmem>>, vector<256x128xf32>
      %cst_23 = arith.constant dense<0.000000e+00> : vector<1x128xf32>
      %36 = tpu.matmul %34, %35, %cst_23 {dimension_numbers = #tpu.dot_dimension_numbers<[1], [0], [0], [1], [0, 0, 1, 1], [], []>} : vector<1x256xf32>, vector<256x128xf32>, vector<1x128xf32> -> vector<1x128xf32>
      %c0_24 = arith.constant 0 : index
      %c0_25 = arith.constant 0 : index
      %37 = vector.load %arg6[%c0_24, %c0_25] : memref<1x128xf32, #tpu.memory_space<vmem>>, vector<1x128xf32>
      %38 = arith.addf %36, %37 : vector<1x128xf32>
      %c0_26 = arith.constant 0 : index
      %c0_27 = arith.constant 0 : index
      %c0_28 = arith.constant 0 : index
      %39 = vector.load %arg7[%c0_26, %c0_27, %c0_28] : memref<1x1x128xf32, #tpu.memory_space<vmem>>, vector<1x1x128xf32>
      %40 = vector.shape_cast %39 : vector<1x1x128xf32> to vector<1x128xf32>
      %41 = vector.shape_cast %38 : vector<1x128xf32> to vector<1x1x128xf32>
      tpu.vector_store %arg7[%c0_26, %c0_27, %c0_28], %41 {strides = array<i32>} : memref<1x1x128xf32, #tpu.memory_space<vmem>>, vector<1x1x128xf32>,
    } else {
    }
    return
  }
  func.func @transform_0(%arg0: i32, %arg1: i32) -> (i32, i32, i32) {
    %c0_i32 = arith.constant 0 : i32
    %c0_i32_0 = arith.constant 0 : i32
    return %arg0, %arg1, %c0_i32 : i32, i32, i32
  }
  func.func @transform_1(%arg0: i32, %arg1: i32) -> (i32, i32) {
    %c0_i32 = arith.constant 0 : i32
    %c0_i32_0 = arith.constant 0 : i32
    %c0_i32_1 = arith.constant 0 : i32
    return %c0_i32, %c0_i32_0 : i32, i32
  }
  func.func @transform_2(%arg0: i32, %arg1: i32) -> (i32, i32) {
    %c0_i32 = arith.constant 0 : i32
    %c0_i32_0 = arith.constant 0 : i32
    %c0_i32_1 = arith.constant 0 : i32
    return %c0_i32, %c0_i32_0 : i32, i32
  }
  func.func @transform_3(%arg0: i32, %arg1: i32) -> (i32, i32) {
    %c0_i32 = arith.constant 0 : i32
    %c0_i32_0 = arith.constant 0 : i32
    %c0_i32_1 = arith.constant 0 : i32
    return %c0_i32, %c0_i32_0 : i32, i32
  }
  func.func @transform_4(%arg0: i32, %arg1: i32) -> (i32, i32) {
    %c0_i32 = arith.constant 0 : i32
    %c0_i32_0 = arith.constant 0 : i32
    %c0_i32_1 = arith.constant 0 : i32
    return %c0_i32, %c0_i32_0 : i32, i32
  }
  func.func @transform_5(%arg0: i32, %arg1: i32) -> (i32, i32, i32) {
    %c0_i32 = arith.constant 0 : i32
    %c0_i32_0 = arith.constant 0 : i32
    %c0_i32_1 = arith.constant 0 : i32
    return %arg0, %c0_i32, %c0_i32_0 : i32, i32, i32
  }
}

</mosaic_0001>

<bundles_post_ra>
// kernel: tpu_custom_call.1
= control target key start
LH: loop header
LB: loop body
LE: loop exit
PB: predicated region body
PF: predicated region fallthrough
CT: control target
= control target key end

     0   :  { %s1557_s0 = inlined_call_operand.hbm [shape: bf16[2,128,256], index: 0, kind: input, shape index: {}]   ;;  %s1558_s1 = inlined_call_operand.hbm [shape: f32[1,256], index: 1, kind: input, shape index: {}]   ;;  %s1559_s2 = inlined_call_operand.hbm [shape: f32[1,256], index: 2, kind: input, shape index: {}]   ;;  %s1560_s3 = inlined_call_operand.hbm [shape: f32[256,128], index: 3, kind: input, shape index: {}]   ;;  %s1561_s4 = inlined_call_operand.hbm [shape: f32[1,128], index: 4, kind: input, shape index: {}]   ;;  %s1562_s5 = inlined_call_operand.hbm [shape: f32[2,1,128], index: 5, kind: output, shape index: {}]  }
   0x1   :  { %1568 = sst [smem:[#allocation17_spill]] %s1558_s1 }
   0x2   :  { %10 = vsyncpa [#allocation4], 0 }
   0x3   :  { %12 = vsyncpa [#allocation4 + $0x1], 0 }
   0x4   :  { %13 = vsyncpa [#allocation7], 0 }
   0x5   :  { %14 = vsyncpa [#allocation10], 0 }
   0x6   :  { %15 = vsyncpa [#allocation5], 0 }
   0x7   :  { %17 = vsyncpa [#allocation5 + $0x1], 0  ;;  %s1212_s18 = smov 0   ;;  %s1214_s19 = smov 0  }
   0x8   :  { %s1216_s20 = smov 0   ;;  %s1218_s21 = smov 0  }
   0x9   :  { %s1220_s22 = smov 0   ;;  %s1222_s23 = smov 0  }
   0xa LB: > { %s741_s24 = sadd.s32 4294967295, %s1170_s23   ;;  %s742_s25 = sadd.s32 4294967294, %s1170_s23   ;;  %s1170_s23 = sphi %s1222_s23, %s23_s23   ;;  %s1166_s22 = sphi %s1220_s22, %s1592_s22   ;;  %s1162_s21 = sphi %s1218_s21, %s1591_s21   ;;  %s1158_s20 = sphi %s1216_s20, %s1590_s20   ;;  %s1154_s19 = sphi %s1214_s19, %s1589_s19   ;;  %s1150_s18 = sphi %s1212_s18, %s1588_s18  }
   0xb   : > { %p57_p0 = scmp.ne.s32.totalorder %s1154_s19, %s1150_s18  ;;  %p1246_p1 = scmp.eq.s32.totalorder %s741_s24, 0 }
   0xc   : > { %p1250_p2 = scmp.eq.s32.totalorder %s741_s24, 1  ;;  %p171_p3 = scmp.eq.s32.totalorder %s742_s25, 1 }
   0xd   : > { %s1569_s26 = scalar_select %p1246_p1, 1, 0 }
   0xe   : > { %s1570_s27 = scalar_select %p1250_p2, 1, 0 }
   0xf   : > { %p1256_p4 = por %p1246_p1, %p57_p0  ;;  %p743_p5 = scmp.ge.s32.totalorder %s1170_s23, 1 }
  0x10   : > { %p1261_p6 = por %p171_p3, %p57_p0  ;;  %p178_p7 = scmp.lt.s32.totalorder %s1170_s23, 3 }
  0x11   : > { %s1571_s28 = scalar_select %p1256_p4, 1, 0 }
  0x12   : > { %s1572_s29 = scalar_select %p1261_p6, 1, 0 }
  0x13   : > { %p1266_p8 = pnand %p743_p5, %p178_p7  ;;  %s1172_s6 = smov [#allocation6]  }
  0x14   : > { %s191_s7 = sshll.u32 %s1172_s6, 4  ;;  %s1173_s8 = smov [#allocation9]   ;;  %s192_s7 = int_to_ptr.vmem [resolvable:$true] %s191_s7 }
  0x15   : > { %s1573_s30 = scalar_select %p1266_p8, 1, 0 }
  0x16   : > { %p849_p10 = pneg %p1266_p8  ;;  %s212_s9 = sshll.u32 %s1173_s8, 4  ;;  %s1279_s9 = int_to_ptr.vmem [resolvable:$true] %s212_s9 }
  0x17   : > { %s1174_s11 = smov [#allocation8]   ;;  %s1575_s1 = sld [smem:[#allocation17_spill]] }
  0x18   : > { %p1275_p11 = pnand %p849_p10, %p1246_p1  ;;  %s1281_s12 = sshll.u32 %s1174_s11, 4  ;;  %s203_s12 = int_to_ptr.vmem [resolvable:$true] %s1281_s12 }
  0x1a   : > { %p1291_p13 = pneg %p1275_p11 }
  0x1d   : > { %s938_s15 = scalar_lea.hbm %s1575_s1, 32 }
  0x1e   : > { %p939_p12 = scmp.ne.s32.totalorder %s1575_s1, %s938_s15  ;;  %p945_p5 = scmp.lt.u32.totalorder %s938_s15, %s1575_s1 }
  0x20   : > { %p941_p0 = pnand %p1291_p13, %p939_p12 }
  0x22   : > { %p942_p3 = pneg %p941_p0 }
  0x24   : > { %p947_p7 = pnand %p945_p5, %p942_p3 }
  0x26   : > { %950 = shalt.err (!%p947_p7)
}
  0x27   : > { %s951_s8 = scalar_lea.vmem %s192_s7, 32  ;;  %p959_p1 = scmp.lt.s32.totalorder %s192_s7, %s192_s7 }
  0x28   : > { %p952_p10 = scmp.ne.s32.totalorder %s192_s7, %s951_s8  ;;  %p960_p4 = scmp.lt.s32.totalorder %s951_s8, %s951_s8 }
  0x2a   : > { %p954_p9 = pnand %p952_p10, %p1291_p13  ;;  %p961_p8 = por %p960_p4, %p959_p1 }
  0x2c   : > { %p955_p6 = pneg %p954_p9 }
  0x2e   : > { %p962_p2 = pnand %p961_p8, %p955_p6 }
  0x30   : > { %965 = shalt.err (!%p962_p2)
}
  0x31   : > { %852 = dma.hbm_to_vmem [thread:$0]  (!%p1275_p11), %s1575_s1, 32, %s192_s7, [#allocation7]  }
  0x32   : > { %s966_s16 = scalar_lea.hbm %s1560_s3, 4096 }
  0x33   : > { %p967_p9 = scmp.ne.s32.totalorder %s1560_s3, %s966_s16  ;;  %p973_p2 = scmp.lt.u32.totalorder %s966_s16, %s1560_s3 }
  0x35   : > { %p969_p12 = pnand %p967_p9, %p1291_p13 }
  0x37   : > { %p970_p1 = pneg %p969_p12 }
  0x39   : > { %p975_p4 = pnand %p973_p2, %p970_p1 }
  0x3b   : > { %978 = shalt.err (!%p975_p4)
}
  0x3c   : > { %s979_s7 = scalar_lea.vmem %s1279_s9, 4096  ;;  %p987_p3 = scmp.lt.s32.totalorder %s1279_s9, %s1279_s9 }
  0x3d   : > { %p980_p6 = scmp.ne.s32.totalorder %s1279_s9, %s979_s7  ;;  %p988_p5 = scmp.lt.s32.totalorder %s979_s7, %s979_s7 }
  0x3f   : > { %p982_p8 = pnand %p980_p6, %p1291_p13  ;;  %p989_p7 = por %p988_p5, %p987_p3 }
  0x41   : > { %p983_p0 = pneg %p982_p8 }
  0x43   : > { %p990_p10 = pnand %p989_p7, %p983_p0 }
  0x45   : > { %993 = shalt.err (!%p990_p10)
}
  0x46   : > { %s1567_s11 = smov 128   ;;  %s1176_s13 = smov 8  }
  0x47   : > { %858 = dma.hbm_to_vmem [thread:$0]  (!%p1275_p11), %s1560_s3, 4096, %s1279_s9, [#allocation10], %s1567_s11, %s1567_s11, %s1176_s13  }
  0x48   : > { %s994_s25 = scalar_lea.hbm %s1559_s2, 32 }
  0x49   : > { %p995_p9 = scmp.ne.s32.totalorder %s1559_s2, %s994_s25  ;;  %p1001_p2 = scmp.lt.u32.totalorder %s994_s25, %s1559_s2 }
  0x4b   : > { %p997_p12 = pnand %p995_p9, %p1291_p13 }
  0x4d   : > { %p998_p1 = pneg %p997_p12 }
  0x4f   : > { %p1003_p4 = pnand %p1001_p2, %p998_p1 }
  0x51   : > { %1006 = shalt.err (!%p1003_p4)
}
  0x52   : > { %s1007_s14 = scalar_lea.vmem %s203_s12, 32  ;;  %p1015_p3 = scmp.lt.s32.totalorder %s203_s12, %s203_s12 }
  0x53   : > { %p1008_p6 = scmp.ne.s32.totalorder %s203_s12, %s1007_s14  ;;  %p1016_p5 = scmp.lt.s32.totalorder %s1007_s14, %s1007_s14 }
  0x55   : > { %p1010_p8 = pnand %p1008_p6, %p1291_p13  ;;  %p1017_p7 = por %p1016_p5, %p1015_p3 }
  0x57   : > { %p1011_p0 = pneg %p1010_p8 }
  0x59   : > { %p1018_p10 = pnand %p1017_p7, %p1011_p0 }
  0x5b   : > { %1021 = shalt.err (!%p1018_p10)
}
  0x5c   : > { %855 = dma.hbm_to_vmem [thread:$0]  (!%p1275_p11), %s1559_s2, 32, %s203_s12, [#allocation7]  }
  0x5d   : > { %s1177_s1 = smov [#allocation11]   ;;  %s1022_s6 = scalar_lea.hbm %s1561_s4, 16 }
  0x5e   : > { %s226_s16 = sshll.u32 %s1177_s1, 4  ;;  %p1023_p9 = scmp.ne.s32.totalorder %s1561_s4, %s1022_s6  ;;  %s227_s16 = int_to_ptr.vmem [resolvable:$true] %s226_s16 }
  0x5f   : > { %p1029_p2 = scmp.lt.u32.totalorder %s1022_s6, %s1561_s4 }
  0x60   : > { %p1025_p12 = pnand %p1023_p9, %p1291_p13 }
  0x62   : > { %p1026_p1 = pneg %p1025_p12 }
  0x64   : > { %p1031_p4 = pnand %p1029_p2, %p1026_p1 }
  0x66   : > { %1034 = shalt.err (!%p1031_p4)
}
  0x67   : > { %s1035_s12 = scalar_lea.vmem %s227_s16, 16  ;;  %s1042_s9 = scalar_lea.vmem %s227_s16, 32 }
  0x68   : > { %p1036_p6 = scmp.ne.s32.totalorder %s227_s16, %s1035_s12  ;;  %p1043_p3 = scmp.lt.s32.totalorder %s227_s16, %s227_s16 }
  0x69   : > { %p1044_p5 = scmp.lt.s32.totalorder %s1042_s9, %s1035_s12 }
  0x6a   : > { %p1038_p8 = pnand %p1036_p6, %p1291_p13 }
  0x6b   : > { %p1045_p7 = por %p1044_p5, %p1043_p3 }
  0x6c   : > { %p1039_p0 = pneg %p1038_p8 }
  0x6e   : > { %p1046_p10 = pnand %p1045_p7, %p1039_p0 }
  0x70   : > { %1049 = shalt.err (!%p1046_p10)
}
  0x71   : > { %861 = dma.hbm_to_vmem [thread:$0]  (!%p1275_p11), %s1561_s4, 16, %s227_s16, [#allocation10]  }
  0x72   : > { %s35_s24 = sadd.s32 1, %s1166_s22  ;;  %s44_s11 = sadd.s32 1, %s1158_s20 }
  0x73   : > { %p37_p13 = scmp.ge.s32.totalorder %s35_s24, 2  ;;  %p51_p9 = scmp.ne.s32.totalorder %s1158_s20, %s1154_s19 }
  0x74   : > { %p52_p12 = scmp.eq.s32.totalorder %s1170_s23, 0  ;;  %p874_p1 = scmp.lt.s32.totalorder %s1170_s23, 2 }
  0x75   : > { %s1594_s24 = smov (%p37_p13, %s35_s24), 0  ;;  %p1577_p4 = scmp.ne.s32.totalorder %s1570_s27, 0 }
  0x76   : > { %p53_p2 = por %p52_p12, %p51_p9  ;;  %s39_s17 = ssub.s32 %s1166_s22, %s1594_s24 }
  0x77   : > { %p1380_p6 = por %p1577_p4, %p51_p9  ;;  %s237_s25 = sand.u32 1, %s1158_s20  }
  0x78   : > { %p42_p8 = scmp.eq.s32.totalorder %s39_s17, 0  ;;  %s749_s16 = sshll.u32 %s237_s25, 7 }
  0x79   : > { %s761_s6 = sshll.u32 %s1166_s22, 11  ;;  %s241_s27 = scalar_lea.vmem [#allocation3], %s749_s16 }
  0x7a   : > { %s1389_s8 = scalar_select %p42_p8, %s1158_s20, %s44_s11  }
  0x7b   : > { %s1394_s12 = scalar_lea.hbm %s1557_s0, %s761_s6  ;;  %s251_s9 = sshll.u32 %s241_s27, 4  ;;  %s1402_s9 = int_to_ptr.vmem [resolvable:$true] %s251_s9 }
  0x7c   : > { %p1398_p11 = pnand %p874_p1, %p53_p2  ;;  %s1404_s1 = scalar_lea.sflag [#allocation4], %s237_s25 }
  0x7d   : > { %s1050_s11 = scalar_lea.hbm %s1394_s12, 2048  ;;  %s1055_s6 = scalar_lea.hbm %s1557_s0, 4096 }
  0x7e   : > { %p1051_p0 = scmp.ne.s32.totalorder %s1394_s12, %s1050_s11  ;;  %p1052_p3 = pneg %p1398_p11 }
  0x7f   : > { %p1056_p10 = scmp.lt.u32.totalorder %s1394_s12, %s1557_s0  ;;  %p1057_p13 = scmp.lt.u32.totalorder %s1055_s6, %s1050_s11 }
  0x80   : > { %p1053_p5 = pnand %p1052_p3, %p1051_p0  ;;  %p1059_p12 = scmp.lt.u32.totalorder %s1050_s11, %s1394_s12 }
  0x81   : > { %p1058_p9 = por %p1057_p13, %p1056_p10 }
  0x82   : > { %p1054_p7 = pneg %p1053_p5 }
  0x83   : > { %p1060_p1 = por %p1059_p12, %p1058_p9 }
  0x85   : > { %p1061_p2 = pnand %p1060_p1, %p1054_p7 }
  0x87   : > { %1064 = shalt.err (!%p1061_p2)
}
  0x88   : > { %s1065_s25 = scalar_lea.vmem %s1402_s9, 2048  ;;  %s1178_s27 = smov [#allocation3]  }
  0x89   : > { %p1066_p4 = scmp.ne.s32.totalorder %s1402_s9, %s1065_s25  ;;  %s1070_s17 = sshll.u32 %s1178_s27, 4  ;;  %s1071_s17 = int_to_ptr.vmem [resolvable:$false] %s1070_s17 }
  0x8a   : > { %s1072_s16 = scalar_lea.vmem %s1071_s17, 4096  ;;  %p1073_p5 = scmp.lt.s32.totalorder %s1402_s9, %s1071_s17 }
  0x8b   : > { %p1068_p8 = pnand %p1066_p4, %p1052_p3  ;;  %p1074_p10 = scmp.lt.s32.totalorder %s1072_s16, %s1065_s25 }
  0x8d   : > { %p1069_p0 = pneg %p1068_p8  ;;  %p1075_p13 = por %p1074_p10, %p1073_p5 }
  0x8f   : > { %p1076_p9 = pnand %p1075_p13, %p1069_p0 }
  0x91   : > { %1079 = shalt.err (!%p1076_p9)
}
  0x92   : > { %s1580_s11 = smov 128   ;;  %p1581_p3 = scmp.ne.s32.totalorder %s1573_s30, 0 }
  0x93   : > { %865 = dma.hbm_to_vmem [thread:$0]  (!%p1398_p11), %s1394_s12, 2048, %s1402_s9, %s1404_s1, %s1580_s11, %s1580_s11, %s1176_s13  }
  0x94   : > { %263 = sbr.rel (%p1581_p3) target bundleno = 783 (0x30f), region = 40  ;;  %s1438_s6 = sand.u32 (!%p1581_p3), 1, %s1154_s19  }
  0x95   : > { %s753_s7 = sshll.u32 (!%p1581_p3), %s1438_s6, 7  ;;  %s266_s14 = scalar_lea.sflag (!%p1581_p3), [#allocation4], %s1438_s6 }
  0x96   : > { %s1442_s25 = scalar_lea.vmem (!%p1581_p3), [#allocation3], %s753_s7  ;;  %p1582_p7 = scmp.ne.s32.totalorder (!%p1581_p3), %s1571_s28, 0 }
  0x9b   : > { %1133 = dma.done.wait (%p1582_p7), %s266_s14, 2048  }
  0x9c   : > { %1135 = vsyncadd (%p1582_p7), %s266_s14, 4294965248  ;;  %p1583_p11 = scmp.ne.s32.totalorder %s1569_s26, 0 }
  0x9e   : > { %1137 = dma.done.wait (%p1583_p11), [#allocation7], 64  }
  0x9f   : > { %1139 = vsyncadd (%p1583_p11), [#allocation7], 4294967232 }
  0xa0   : > { %1141 = dma.done.wait (%p1583_p11), [#allocation10], 4112  }
  0xa1   : > { %1143 = vsyncadd (%p1583_p11), [#allocation10], 4294963184  ;;  %v316_v0 = vlaneseq  ;;  %v1179_v2 = vmov 0.0   ;;  %v321_v3 = vld [vmem:[%s1442_s25] sm:$0xff]  ;;  %v322_v4 = vld [vmem:[%s1442_s25 + $0x8] sm:$0xff]  ;;  %vm452_vm1 = vcmask 1040384  }
  0xa2   : > { %v323_v5 = vld [vmem:[%s1442_s25 + $0x10] sm:$0xff]  ;;  %v337_v6 = vunpack.c.l.bf16 %v321_v3  ;;  %v338_v7 = vunpack.c.h.bf16 %v321_v3  ;;  %v339_v8 = vunpack.c.l.bf16 %v322_v4  ;;  %v340_v9 = vunpack.c.h.bf16 %v322_v4  ;;  %v324_v10 = vld [vmem:[%s1442_s25 + $0x18] sm:$0xff]  ;;  %v325_v13 = vld [vmem:[%s1442_s25 + $0x20] sm:$0xff]  ;;  %s758_s26 = sshll.u32 %s1162_s21, 4  ;;  %s310_s28 = scalar_lea.vmem [#allocation12], %s1438_s6 }
  0xa3   : > { %vm1457_vm0 = vcmp.lt.s32.totalorder %v316_v0, 256  ;;  %v341_v11 = vunpack.c.l.bf16 %v323_v5  ;;  %v342_v12 = vunpack.c.h.bf16 %v323_v5  ;;  %v343_v14 = vunpack.c.l.bf16 %v324_v10  ;;  %v326_v18 = vld [vmem:[%s1442_s25 + $0x28] sm:$0xff]  ;;  %v327_v23 = vld [vmem:[%s1442_s25 + $0x30] sm:$0xff]  ;;  %v328_v28 = vld [vmem:[%s1442_s25 + $0x38] sm:$0xff]  ;;  %s626_s30 = sshll.u32 %s310_s28, 4  ;;  %s1508_s9 = scalar_lea.hbm %s1562_s5, %s758_s26  ;;  %s1510_s30 = int_to_ptr.vmem [resolvable:$true] %s626_s30 }
  0xa4   : > { %320 = vst.msk [vmem:[#allocation2] sm:$0x3] %vm1457_vm0, %v1179_v2  ;;  %v344_v15 = vunpack.c.h.bf16 %v324_v10  ;;  %v370_v16 = vadd.f32 %v339_v8, %v337_v6  ;;  %v391_v17 = vadd.f32 %v340_v9, %v338_v7  ;;  %v345_v19 = vunpack.c.l.bf16 %v325_v13  ;;  %v329_v33 = vld [vmem:[%s1442_s25 + $0x40] sm:$0xff]  ;;  %v330_v38 = vld [vmem:[%s1442_s25 + $0x48] sm:$0xff]  ;;  %v331_v43 = vld [vmem:[%s1442_s25 + $0x50] sm:$0xff]  ;;  %s614_s15 = scalar_lea.sflag [#allocation5], %s1438_s6 }
  0xa5   : > { %v346_v20 = vunpack.c.h.bf16 %v325_v13  ;;  %v347_v24 = vunpack.c.l.bf16 %v326_v18  ;;  %v348_v25 = vunpack.c.h.bf16 %v326_v18  ;;  %v349_v29 = vunpack.c.l.bf16 %v327_v23  ;;  %v332_v48 = vld [vmem:[%s1442_s25 + $0x58] sm:$0xff]  ;;  %v333_v53 = vld [vmem:[%s1442_s25 + $0x60] sm:$0xff]  ;;  %v334_v58 = vld [vmem:[%s1442_s25 + $0x68] sm:$0xff]  ;;  %s1080_s1 = scalar_lea.vmem %s1510_s30, 16  ;;  %s1181_s21 = smov [#allocation12]  }
  0xa6   : > { %v371_v21 = vadd.f32 %v370_v16, %v341_v11  ;;  %v392_v22 = vadd.f32 %v391_v17, %v342_v12  ;;  %v350_v30 = vunpack.c.h.bf16 %v327_v23  ;;  %v351_v34 = vunpack.c.l.bf16 %v328_v28  ;;  %v335_v63 = vld [vmem:[%s1442_s25 + $0x70] sm:$0xff]  ;;  %v336_v6 = vld [vmem:[%s1442_s25 + $0x78] sm:$0xff]  ;;  %p1081_p12 = scmp.ne.s32.totalorder %s1510_s30, %s1080_s1  ;;  %s1084_s27 = sshll.u32 %s1181_s21, 4  ;;  %s1085_s27 = int_to_ptr.vmem [resolvable:$false] %s1084_s27 }
  0xa7   : > { %v352_v35 = vunpack.c.h.bf16 %v328_v28  ;;  %v353_v39 = vunpack.c.l.bf16 %v329_v33  ;;  %v354_v40 = vunpack.c.h.bf16 %v329_v33  ;;  %v355_v44 = vunpack.c.l.bf16 %v330_v38  ;;  %v515_v1 = vld [vmem:[#allocation9 + $0x88] sm:$0xff]  ;;  %s1086_s17 = scalar_lea.vmem %s1085_s27, 32  ;;  %p1087_p4 = scmp.lt.s32.totalorder %s1510_s30, %s1085_s27 }
  0xa8   : > { %v372_v26 = vadd.f32 %v371_v21, %v343_v14  ;;  %v393_v27 = vadd.f32 %v392_v22, %v344_v15  ;;  %v356_v45 = vunpack.c.h.bf16 %v330_v38  ;;  %v357_v49 = vunpack.c.l.bf16 %v331_v43  ;;  %p1082_p1 = pnand %p1081_p12, %p1380_p6  ;;  %p1088_p8 = scmp.lt.s32.totalorder %s1086_s17, %s1080_s1 }
  0xa9   : > { %v358_v50 = vunpack.c.h.bf16 %v331_v43  ;;  %v359_v54 = vunpack.c.l.bf16 %v332_v48  ;;  %v360_v55 = vunpack.c.h.bf16 %v332_v48  ;;  %v361_v59 = vunpack.c.l.bf16 %v333_v53 }
  0xaa   : > { %v373_v31 = vadd.f32 %v372_v26, %v345_v19  ;;  %v394_v32 = vadd.f32 %v393_v27, %v346_v20  ;;  %v362_v60 = vunpack.c.h.bf16 %v333_v53  ;;  %v363_v2 = vunpack.c.l.bf16 %v334_v58  ;;  %v516_v53 = vld [vmem:[#allocation9 + $0x90] sm:$0xff]  ;;  %p1083_p2 = pneg %p1082_p1  ;;  %p1089_p0 = por %p1088_p8, %p1087_p4 }
  0xab   : > { %v364_v3 = vunpack.c.h.bf16 %v334_v58  ;;  %v365_v7 = vunpack.c.l.bf16 %v335_v63  ;;  %v366_v8 = vunpack.c.h.bf16 %v335_v63  ;;  %v367_v11 = vunpack.c.l.bf16 %v336_v6  ;;  %v369_v38 = vld [vmem:[#allocation2] sm:$0x3] }
  0xac   : > { %v374_v36 = vadd.f32 %v373_v31, %v347_v24  ;;  %v395_v37 = vadd.f32 %v394_v32, %v348_v25  ;;  %v368_v12 = vunpack.c.h.bf16 %v336_v6  ;;  %v1180_v23 = vmov 1966171168   ;;  %v501_v58 = vld [vmem:[#allocation9 + $0x18] sm:$0xff]  ;;  %p1090_p5 = pnand %p1089_p0, %p1083_p2 }
  0xad   : > { %v416_v24 = vunpack.c.l.s4 %v1180_v23  ;;  %v507_v23 = vld [vmem:[#allocation9 + $0x48] sm:$0xff] }
  0xae   : > { %v375_v41 = vadd.f32 %v374_v36, %v349_v29  ;;  %v396_v42 = vadd.f32 %v395_v37, %v350_v30  ;;  %v419_v30 = vshrl.u32 %v316_v0, 7 }
  0xaf   : > { %v417_v29 = vunpack.c.0.s8 %v416_v24 }
  0xb0   : > { %v376_v46 = vadd.f32 %v375_v41, %v351_v34  ;;  %v397_v47 = vadd.f32 %v396_v42, %v352_v35  ;;  %v1482_v41 = vsub.s32 0, %v419_v30  ;;  %v1484_v42 = vsub.s32 1, %v419_v30 }
  0xb1   : > { %v420_v35 = vsub.s32 %v417_v29, %v419_v30  ;;  %v508_v29 = vld [vmem:[#allocation9 + $0x50] sm:$0xff]  ;;  %v509_v30 = vld [vmem:[#allocation9 + $0x58] sm:$0xff] }
  0xb2   : > { %v377_v51 = vadd.f32 %v376_v46, %v353_v39  ;;  %v398_v52 = vadd.f32 %v397_v47, %v354_v40 }
  0xb4   : > { %v378_v56 = vadd.f32 %v377_v51, %v355_v44  ;;  %v399_v57 = vadd.f32 %v398_v52, %v356_v45  ;;  %v499_v52 = vld [vmem:[#allocation9 + $0x8] sm:$0xff] }
  0xb6   : > { %v379_v61 = vadd.f32 %v378_v56, %v357_v49  ;;  %v400_v62 = vadd.f32 %v399_v57, %v358_v50  ;;  %v514_v49 = vld [vmem:[#allocation9 + $0x80] sm:$0xff]  ;;  %v500_v57 = vld [vmem:[#allocation9 + $0x10] sm:$0xff] }
  0xb7   : > { %v498_v50 = vld [vmem:[#allocation9] sm:$0xff]  ;;  %v797_v51 = vpack.c.bf16 %v515_v1, %v514_v49  ;;  %v494_v1 = vld [vmem:[#allocation6] sm:$0x3] }
  0xb8   : > { %v380_v4 = vadd.f32 %v379_v61, %v359_v54  ;;  %v401_v5 = vadd.f32 %v400_v62, %v360_v55  ;;  %v517_v54 = vld [vmem:[#allocation9 + $0x98] sm:$0xff]  ;;  %v799_v55 = vpack.c.bf16 %v499_v52, %v498_v50 }
  0xb9   : > { %v801_v56 = vpack.c.bf16 %v517_v54, %v516_v53  ;;  %798 = vmatprep.subr.bf16.mxu0 %v797_v51  ;;  %v496_v51 = vld [vmem:[#allocation8] sm:$0x3] }
  0xba   : > { %v381_v9 = vadd.f32 %v380_v4, %v361_v59  ;;  %v402_v10 = vadd.f32 %v401_v5, %v362_v60  ;;  %800 = vmatpush3.bf16.msra.mxu0 %v799_v55  ;;  %v803_v59 = vpack.c.bf16 %v501_v58, %v500_v57  ;;  %v530_v57 = vld [vmem:[#allocation11] sm:$0x1] }
  0xbb   : > { %802 = vmatprep.subr.bf16.mxu0 %v801_v56 }
  0xbc   : > { %v382_v13 = vadd.f32 %v381_v9, %v363_v2  ;;  %v403_v14 = vadd.f32 %v402_v10, %v364_v3  ;;  %v519_v9 = vld [vmem:[#allocation9 + $0xa8] sm:$0xff] }
  0xbe   : > { %v383_v15 = vadd.f32 %v382_v13, %v365_v7  ;;  %v404_v16 = vadd.f32 %v403_v14, %v366_v8  ;;  %804 = vmatpush3.bf16.msra.mxu0 %v803_v59  ;;  %v518_v8 = vld [vmem:[#allocation9 + $0xa0] sm:$0xff]  ;;  %v520_v14 = vld [vmem:[#allocation9 + $0xb0] sm:$0xff] }
  0xbf   : > { %v805_v10 = vpack.c.bf16 %v519_v9, %v518_v8 }
  0xc0   : > { %v384_v17 = vadd.f32 %v383_v15, %v367_v11  ;;  %v405_v18 = vadd.f32 %v404_v16, %v368_v12  ;;  %v502_v11 = vld [vmem:[#allocation9 + $0x20] sm:$0xff]  ;;  %v503_v12 = vld [vmem:[#allocation9 + $0x28] sm:$0xff]  ;;  %v521_v15 = vld [vmem:[#allocation9 + $0xb8] sm:$0xff] }
  0xc1   : > { %v807_v13 = vpack.c.bf16 %v503_v12, %v502_v11  ;;  %806 = vmatprep.subr.bf16.mxu0 %v805_v10  ;;  %v809_v16 = vpack.c.bf16 %v521_v15, %v520_v14 }
  0xc2   : > { %v385_v19 = vrot.slane %v384_v17, 4  ;;  %v406_v20 = vrot.slane %v405_v18, 4 }
  0xc3   : > { %808 = vmatpush3.bf16.msra.mxu0 %v807_v13 }
  0xc4   : > { %v386_v21 = vadd.f32 %v385_v19, %v384_v17  ;;  %v407_v22 = vadd.f32 %v406_v20, %v405_v18  ;;  %v504_v17 = vld [vmem:[#allocation9 + $0x30] sm:$0xff]  ;;  %v505_v18 = vld [vmem:[#allocation9 + $0x38] sm:$0xff]  ;;  %v522_v19 = vld [vmem:[#allocation9 + $0xc0] sm:$0xff]  ;;  %810 = vmatprep.subr.bf16.mxu0 %v809_v16 }
  0xc5   : > { %v811_v20 = vpack.c.bf16 %v505_v18, %v504_v17 }
  0xc6   : > { %v387_v25 = vrot.slane %v386_v21, 2  ;;  %v408_v26 = vrot.slane %v407_v22, 2 }
  0xc7   : > { %812 = vmatpush3.bf16.msra.mxu0 %v811_v20 }
  0xc8   : > { %v388_v27 = vadd.f32 %v387_v25, %v386_v21  ;;  %v409_v28 = vadd.f32 %v408_v26, %v407_v22  ;;  %v523_v21 = vld [vmem:[#allocation9 + $0xc8] sm:$0xff]  ;;  %v506_v22 = vld [vmem:[#allocation9 + $0x40] sm:$0xff]  ;;  %v524_v25 = vld [vmem:[#allocation9 + $0xd0] sm:$0xff] }
  0xc9   : > { %v813_v24 = vpack.c.bf16 %v523_v21, %v522_v19  ;;  %v525_v26 = vld [vmem:[#allocation9 + $0xd8] sm:$0xff] }
  0xca   : > { %v389_v31 = vrot.slane %v388_v27, 1  ;;  %v410_v32 = vrot.slane %v409_v28, 1 }
  0xcb   : > { %814 = vmatprep.subr.bf16.mxu0 %v813_v24 }
  0xcc   : > { %v390_v33 = vadd.f32 %v389_v31, %v388_v27  ;;  %v411_v34 = vadd.f32 %v410_v32, %v409_v28  ;;  %v815_v27 = vpack.c.bf16 %v507_v23, %v506_v22  ;;  %v817_v28 = vpack.c.bf16 %v525_v26, %v524_v25  ;;  %v526_v31 = vld [vmem:[#allocation9 + $0xe0] sm:$0xff]  ;;  %v527_v32 = vld [vmem:[#allocation9 + $0xe8] sm:$0xff] }
  0xce   : > { %v414_v36 = vcombine.low %v390_v33, %v411_v34  ;;  %816 = vmatpush3.bf16.msra.mxu0 %v815_v27  ;;  %v819_v33 = vpack.c.bf16 %v509_v30, %v508_v29  ;;  %v821_v34 = vpack.c.bf16 %v527_v32, %v526_v31 }
  0xcf   : > { %818 = vmatprep.subr.bf16.mxu0 %v817_v28 }
  0xd0   : > { %v421_v37 = vrot.slane %v414_v36, %v420_v35  ;;  %v511_v36 = vld [vmem:[#allocation9 + $0x68] sm:$0xff] }
  0xd2   : > { %v428_v39 = vrot.slane %v421_v37, %v420_v35  ;;  %v510_v35 = vld [vmem:[#allocation9 + $0x60] sm:$0xff]  ;;  %v528_v37 = vld [vmem:[#allocation9 + $0xf0] sm:$0xff]  ;;  %820 = vmatpush3.bf16.msra.mxu0 %v819_v33 }
  0xd3   : > { %822 = vmatprep.subr.bf16.mxu0 %v821_v34 }
  0xd4   : > { %v430_v40 = vadd.f32 %v428_v39, %v369_v38  ;;  %v529_v38 = vld [vmem:[#allocation9 + $0xf8] sm:$0xff]  ;;  %v823_v39 = vpack.c.bf16 %v511_v36, %v510_v35 }
  0xd6   : > { %435 = vst.msk [vmem:[#allocation2] sm:$0x3] %vm1457_vm0, %v430_v40  ;;  %v825_v40 = vpack.c.bf16 %v529_v38, %v528_v37  ;;  %824 = vmatpush3.bf16.msra.mxu0 %v823_v39 }
  0xd8   : > { %826 = vmatprep.subr.bf16.mxu0 %v825_v40 }
  0xdd   : > { %v439_v43 = vld [vmem:[#allocation2] sm:$0x3] }
  0xde   : > { %v440_v44 = vmul.f32 0.0078125, %v439_v43  ;;  %v512_v43 = vld [vmem:[#allocation9 + $0x70] sm:$0xff] }
  0xe0   : > { %v445_v0 = vrot.slane %v440_v44, %v1482_v41  ;;  %v449_v45 = vrot.slane %v440_v44, %v1484_v42 }
  0xe2   : > { %v453_v46 = vsel %vm452_vm1, %v445_v0, 0.0  ;;  %v454_v47 = vsel %vm452_vm1, %v449_v45, 0.0 }
  0xe3   : > { %v455_v48 = vadd.f32 %v454_v47, %v453_v46 }
  0xe5   : > { %456 = vadd.xlane.f32.xlu0 %v455_v48 }
 0x172   : > { %v457_v60 = vpop.xlane.xlu0 %456 }
 0x173   : > { %v459_v61 = vmul.f32 0.00390625, %v457_v60 }
 0x175   : > { %v464_v62 = vrot.slane %v459_v61, %v1482_v41 }
 0x177   : > { %v1491_v63 = vsub.f32 %v440_v44, %v464_v62  ;;  %v513_v44 = vld [vmem:[#allocation9 + $0x78] sm:$0xff] }
 0x178   : > { %v827_v0 = vpack.c.bf16 %v513_v44, %v512_v43 }
 0x179   : > { %v467_v2 = vmul.f32 %v1491_v63, %v1491_v63 }
 0x17a   : > { %828 = vmatpush3.bf16.msra.mxu0 %v827_v0 }
 0x17b   : > { %v472_v3 = vrot.slane %v467_v2, %v1482_v41  ;;  %v476_v4 = vrot.slane %v467_v2, %v1484_v42 }
 0x17d   : > { %v479_v5 = vsel %vm452_vm1, %v472_v3, 0.0  ;;  %v480_v6 = vsel %vm452_vm1, %v476_v4, 0.0 }
 0x17e   : > { %v481_v7 = vadd.f32 %v480_v6, %v479_v5 }
 0x180   : > { %482 = vadd.xlane.f32.xlu0 %v481_v7 }
 0x20d   : > { %v483_v45 = vpop.xlane.xlu0 %482 }
 0x20e   : > { %v484_v46 = vmul.f32 0.00390625, %v483_v45 }
 0x210   : > { %v485_v47 = vadd.f32 1e-05, %v484_v46 }
 0x212   : > { %936 = vrsqrt.f32 %v485_v47 }
 0x21c   : > { %v937_v48 = vpop.eup %936 }
 0x21d   : > { %v491_v49 = vrot.slane %v937_v48, %v1482_v41 }
 0x21f   : > { %v493_v50 = vmul.f32 %v491_v49, %v1491_v63 }
 0x221   : > { %v495_v52 = vmul.f32 %v494_v1, %v493_v50 }
 0x223   : > { %v497_v53 = vadd.f32 %v496_v51, %v495_v52 }
 0x225   : > { %v539_v54 = vrot.slane %v497_v53, %v1484_v42  ;;  %v535_v55 = vrot.slane %v497_v53, %v1482_v41 }
 0x227   : > { %606 = vmatprep.mubr.f32.mxu0 %v539_v54 }
 0x228   : > { %607 = vmatmul.mubr.f32.vlgmr.msra.gmra.mrb[0].mxu0 %v535_v55 }
 0x2fb   : > { %v794_v56 = vpop.f32.mrb[0].mxu0 }
 0x2fc   : > { %v795_v58 = vpop.f32.mrb[1].mxu0 }
 0x2fd   : > { %v796_v59 = vadd.f32 %v795_v58, %v794_v56 }
 0x2ff   : > { %v609_v60 = vadd.f32 %v796_v59, %v530_v57 }
 0x301   : > { %612 = vst [vmem:[%s310_s28] sm:$0x1] %v609_v60 }
 0x302   : > { %1093 = shalt.err (!%p1090_p5)
}
 0x303   : > { %s1094_s16 = scalar_lea.hbm %s1508_s9, 16  ;;  %s1098_s7 = scalar_lea.hbm %s1562_s5, 32 }
 0x304   : > { %p1095_p10 = scmp.ne.s32.totalorder %s1508_s9, %s1094_s16  ;;  %p1099_p3 = scmp.lt.u32.totalorder %s1508_s9, %s1562_s5 }
 0x305   : > { %p1100_p7 = scmp.lt.u32.totalorder %s1098_s7, %s1094_s16  ;;  %p1102_p12 = scmp.lt.u32.totalorder %s1094_s16, %s1508_s9 }
 0x306   : > { %p1096_p13 = pnand %p1095_p10, %p1380_p6 }
 0x307   : > { %p1101_p11 = por %p1100_p7, %p1099_p3 }
 0x308   : > { %p1097_p9 = pneg %p1096_p13 }
 0x309   : > { %p1103_p1 = por %p1102_p12, %p1101_p11 }
 0x30b   : > { %p1104_p2 = pnand %p1103_p1, %p1097_p9 }
 0x30d   : > { %1107 = shalt.err (!%p1104_p2)
}
 0x30e   : > { %847 = dma.vmem_to_hbm [thread:$0]  (%p1380_p6), %s1510_s30, 16, %s1508_s9, %s614_s15  }
 0x30f PF: > { %s638_s26 = sand.u32 1, %s1150_s18   ;;  %p1586_p4 = scmp.ne.s32.totalorder %s1572_s29, 0 }
 0x310   : > { %p1587_p8 = scmp.ge.s32.totalorder %s1170_s23, 2  ;;  %s639_s28 = scalar_lea.sflag [#allocation5], %s638_s26 }
 0x312   : > { %p867_p0 = pnand %p1587_p8, %p1586_p4 }
 0x314   : > { %1145 = dma.done.wait (!%p867_p0), %s639_s28, 16  }
 0x315   : > { %1147 = vsyncadd (!%p867_p0), %s639_s28, 4294967280  ;;  %s23_s23 = sadd.s32 1, %s1170_s23   ;;  %s1588_s18 = smov %s1154_s19 }
 0x316   : > { %p20_p5 = scmp.ge.s32.totalorder %s23_s23, 4   ;;  %s1589_s19 = smov %s1158_s20 }
 0x317   : > { %s1590_s20 = smov %s1389_s8  ;;  %s1591_s21 = smov %s1166_s22 }
 0x318   : > { %s1592_s22 = smov %s1594_s24  ;;  %22 = sbr.rel (!%p20_p5) target bundleno = 10 (0xa), region = 109 }
 0x31f   :  { %643 = vsyncpa [#allocation4], 1 }
 0x320   :  { %645 = vsyncpa [#allocation4 + $0x1], 1 }
 0x321   :  { %646 = vsyncpa [#allocation7], 1 }
 0x322   :  { %647 = vsyncpa [#allocation10], 1 }
 0x323   :  { %648 = vsyncpa [#allocation5], 1 }
 0x324   :  { %650 = vsyncpa [#allocation5 + $0x1], 1 }

</bundles_post_ra>
